<compile_context>
chip_gen: v6e
topology: v6e:2x2x1
jax: 0.10.0
libtpu: 0.0.40
codegen_flags: <defaults>
</compile_context>

<pallas_src>
import functools
import math

import jax
import jax.numpy as jnp
from jax import lax
from jax.experimental import pallas as pl
from jax.experimental.pallas import tpu as pltpu

EPS = 1e-5  # nn.BatchNorm2d default eps


# --------------------------------------------------------------------------- #
# Generation-aware budgets / tile helpers
# --------------------------------------------------------------------------- #
def _vmem_capacity_bytes():
    """Physical VMEM per TensorCore; conservative default if the query fails."""
    try:
        info = pltpu.get_tpu_info()
        for attr in ("vmem_capacity_bytes", "vmem_bytes", "vmem_size_bytes"):
            val = getattr(info, attr, None)
            if val:
                return int(val)
    except Exception:
        pass
    return 64 * 1024 * 1024  # v7x-safe lower bound


def _budgets():
    """(block_target_bytes, vmem_limit_bytes, fused_threshold_bytes_f32)."""
    cap = _vmem_capacity_bytes()
    if cap >= 100 * 1024 * 1024:        # v5e / v6e: 128 MiB per core
        vmem_limit = 64 * 1024 * 1024
        block_target = 8 * 1024 * 1024
    else:                               # v7x: 64 MiB per core
        vmem_limit = 32 * 1024 * 1024
        block_target = 4 * 1024 * 1024
    fused_threshold = vmem_limit // 4
    return block_target, vmem_limit, fused_threshold


def _sublane_quantum(dtype):
    # sub-32-bit dtypes pack along sublanes
    return {4: 8, 2: 16, 1: 32}.get(jnp.dtype(dtype).itemsize, 8)


def _largest_aligned_divisor(dim, quantum, target):
    """Largest divisor of `dim` that is a multiple of `quantum` and <= target."""
    hi = min(target, dim)
    hi -= hi % quantum
    for cand in range(hi, quantum - 1, -quantum):
        if dim % cand == 0:
            return cand
    return None


# --------------------------------------------------------------------------- #
# Kernels
# --------------------------------------------------------------------------- #
def _bn_fused_kernel(x_ref, g_ref, b_ref, o_ref):
    """Whole tensor resident in VMEM: stats + normalize in one pass."""
    x = x_ref[...]                                     # (N, C, HW)
    if x.dtype != jnp.float32:
        x = x.astype(jnp.float32)
    inv_count = 1.0 / float(x.shape[0] * x.shape[2])
    s = jnp.sum(x, axis=2, keepdims=True)
    s = jnp.sum(s, axis=0, keepdims=True)              # (1, C, 1)
    mean = s * inv_count
    xc = x - mean
    v = jnp.sum(xc * xc, axis=2, keepdims=True)
    v = jnp.sum(v, axis=0, keepdims=True)
    var = v * inv_count
    inv = lax.rsqrt(var + EPS)
    g = g_ref[...].astype(jnp.float32)[None]           # (1, C, 1)
    b = b_ref[...].astype(jnp.float32)[None]
    o_ref[...] = (xc * (g * inv) + b).astype(o_ref.dtype)


def _bn_stats_kernel(x_ref, g_ref, b_ref, scale_ref, shift_ref,
                     pivot_sc, sum_sc, sq_sc, *, inv_count, hw, hw_tile, mask_hw):
    # grid = (C_tiles, N, HW_tiles); axes 1 and 2 are the reduction axes.
    n = pl.program_id(1)
    l = pl.program_id(2)

    x = x_ref[0]                                       # (c_tile, hw_tile)
    if x.dtype != jnp.float32:
        x = x.astype(jnp.float32)

    @pl.when(jnp.logical_and(n == 0, l == 0))
    def _():
        # Per-channel pivot: subtracting it keeps E[x^2]-mean^2 numerically
        # stable when |mean| >> std.
        pivot_sc[...] = x[:, 0:1]
        sum_sc[...] = jnp.zeros_like(sum_sc)
        sq_sc[...] = jnp.zeros_like(sq_sc)

    xc = x - pivot_sc[...]
    if mask_hw:
        # cdiv grid: zero out-of-range lanes of the last HW tile.
        valid = hw - l * hw_tile
        lane = lax.broadcasted_iota(jnp.int32, xc.shape, 1)
        xc = jnp.where(lane < valid, xc, 0.0)
    sum_sc[...] += jnp.sum(xc, axis=-1, keepdims=True)
    sq_sc[...] += jnp.sum(xc * xc, axis=-1, keepdims=True)

    is_last = jnp.logical_and(n == pl.num_programs(1) - 1,
                              l == pl.num_programs(2) - 1)

    @pl.when(is_last)
    def _():
        d = sum_sc[...] * inv_count                    # E[x - pivot]
        var = jnp.maximum(sq_sc[...] * inv_count - d * d, 0.0)
        mean = pivot_sc[...] + d
        inv = lax.rsqrt(var + EPS)
        g = g_ref[...].astype(jnp.float32)
        b = b_ref[...].astype(jnp.float32)
        scale = g * inv
        scale_ref[...] = scale
        shift_ref[...] = b - mean * scale


def _bn_norm_kernel(x_ref, scale_ref, shift_ref, o_ref):
    x = x_ref[...]                                     # (1, c_tile, hw_tile)
    if x.dtype != jnp.float32:
        x = x.astype(jnp.float32)
    scale = scale_ref[...][None]                       # (1, c_tile, 1)
    shift = shift_ref[...][None]
    o_ref[...] = (x * scale + shift).astype(o_ref.dtype)


# --------------------------------------------------------------------------- #
# Wrapper
# --------------------------------------------------------------------------- #
def batchnorm2d(x, gamma, beta, *, fuse=None, block_target_bytes=None):
    """BatchNorm2d forward with batch statistics. x is NCHW."""
    N, C, H, W = x.shape
    HW = H * W
    x3 = x.reshape(N, C, HW)            # contiguous reshape: no HBM transpose
    g2 = gamma.reshape(C, 1)
    b2 = beta.reshape(C, 1)

    itemsize = jnp.dtype(x.dtype).itemsize
    block_target, vmem_limit, fused_threshold = _budgets()
    if block_target_bytes is not None:
        block_target = int(block_target_bytes)

    # ----------------- fused single-call path for small activations ---------
    if fuse is None:
        fuse = (N * C * HW * 4) <= fused_threshold
    if fuse:
        out = pl.pallas_call(
            _bn_fused_kernel,
            out_shape=jax.ShapeDtypeStruct((N, C, HW), x.dtype),
            compiler_params=pltpu.CompilerParams(vmem_limit_bytes=vmem_limit),
        )(x3, g2, b2)
        return out.reshape(N, C, H, W)

    # ----------------- streaming two-pass path ------------------------------
    quantum = _sublane_quantum(x.dtype)
    c_tile = None
    if C >= 2 * quantum:
        # prefer >= 2 channel tiles so pass 1's parallel axis can shard (v7x)
        c_tile = _largest_aligned_divisor(C, quantum, min(256, C // 2))
    if c_tile is None:
        c_tile = _largest_aligned_divisor(C, quantum, min(256, C))
    if c_tile is None:
        c_tile = C                      # tiny / unaligned C: full-dim block
    c_tiles = C // c_tile

    # Lane-dense HW tiles sized so each x block is ~block_target bytes.
    hw_target = max(128, (block_target // (c_tile * itemsize)) // 128 * 128)
    if HW <= hw_target:
        hw_tile = HW                    # full dim: always a legal block
    else:
        d = _largest_aligned_divisor(HW, 128, hw_target)
        hw_tile = d if (d is not None and 2 * d > hw_target) else hw_target
    hw_tiles = math.ceil(HW / hw_tile)
    mask_hw = (HW % hw_tile) != 0       # cdiv grid -> mask the last HW tile

    x_spec = pl.BlockSpec((1, c_tile, hw_tile), lambda c, n, l: (n, c, l))
    # per-channel vectors indexed only by the C tile: resident across (N, HW)
    cvec_spec = pl.BlockSpec((c_tile, 1), lambda c, n, l: (c, 0))

    # ------------- pass 1: per-channel stats -> fused scale/shift -----------
    scale, shift = pl.pallas_call(
        functools.partial(_bn_stats_kernel, inv_count=1.0 / float(N * HW),
                          hw=HW, hw_tile=hw_tile, mask_hw=mask_hw),
        out_shape=(jax.ShapeDtypeStruct((C, 1), jnp.float32),
                   jax.ShapeDtypeStruct((C, 1), jnp.float32)),
        grid_spec=pltpu.PrefetchScalarGridSpec(
            num_scalar_prefetch=0,
            grid=(c_tiles, N, hw_tiles),             # reduction axes last
            in_specs=[x_spec, cvec_spec, cvec_spec],
            out_specs=(cvec_spec, cvec_spec),
            scratch_shapes=[pltpu.VMEM((c_tile, 1), jnp.float32),   # pivot
                            pltpu.VMEM((c_tile, 1), jnp.float32),   # sum
                            pltpu.VMEM((c_tile, 1), jnp.float32)]), # sum sq
        compiler_params=pltpu.CompilerParams(
            dimension_semantics=("parallel", "arbitrary", "arbitrary"),
            vmem_limit_bytes=vmem_limit),
    )(x3, g2, b2)

    # ------------- pass 2: normalize (no reduction -> fully parallel) -------
    out = pl.pallas_call(
        _bn_norm_kernel,
        out_shape=jax.ShapeDtypeStruct((N, C, HW), x.dtype),
        grid_spec=pltpu.PrefetchScalarGridSpec(
            num_scalar_prefetch=0,
            grid=(c_tiles, N, hw_tiles),
            in_specs=[x_spec, cvec_spec, cvec_spec],
            out_specs=x_spec),
        compiler_params=pltpu.CompilerParams(
            dimension_semantics=("parallel", "parallel", "parallel"),
            vmem_limit_bytes=vmem_limit),
    )(x3, scale, shift)

    return out.reshape(N, C, H, W)


# --------------------------------------------------------------------------- #
# Demo / correctness check
# --------------------------------------------------------------------------- #
def _ref_bn(x, gamma, beta):
    C = x.shape[1]
    mean = jnp.mean(x, axis=(0, 2, 3), keepdims=True)
    var = jnp.mean((x - mean) ** 2, axis=(0, 2, 3), keepdims=True)
    return (x - mean) / jnp.sqrt(var + EPS) * gamma.reshape(1, C, 1, 1) \
        + beta.reshape(1, C, 1, 1)


if __name__ == "__main__":
    # Primary small-shape run (takes the fused single-call path).
    key = jax.random.PRNGKey(0)
    N, C, H, W = 2, 4, 16, 16
    x = jax.random.normal(key, (N, C, H, W), dtype=jnp.float32)
    gamma = jnp.ones((C,), dtype=jnp.float32)   # nn.BatchNorm2d default affine
    beta = jnp.zeros((C,), dtype=jnp.float32)

    # TODO(synk): running_mean/running_var buffer updates (training-mode
    # side-effect of nn.BatchNorm2d) are not part of the forward output and
    # are not modeled.
    y = batchnorm2d(x, gamma, beta)
    jax.block_until_ready(y)
    assert jnp.allclose(y, _ref_bn(x, gamma, beta), atol=1e-4, rtol=1e-4)

    # Secondary check: force the streaming two-pass path with tiny blocks so
    # the multi-tile grid and masked last HW tile are exercised on-device.
    k1, k2, k3 = jax.random.split(jax.random.PRNGKey(1), 3)
    N2, C2, H2, W2 = 2, 24, 20, 20
    x2 = jax.random.normal(k1, (N2, C2, H2, W2), dtype=jnp.float32) * 2.0 + 3.0
    g2 = jax.random.normal(k2, (C2,), dtype=jnp.float32)
    b2 = jax.random.normal(k3, (C2,), dtype=jnp.float32)
    y2 = batchnorm2d(x2, g2, b2, fuse=False, block_target_bytes=4096)
    jax.block_until_ready(y2)
    assert jnp.allclose(y2, _ref_bn(x2, g2, b2), atol=2e-4, rtol=2e-4)

    print("KERNEL_OK")
</pallas_src>

<mosaic_0001>
module attributes {stable_mosaic.version = 11 : i64} {
  func.func @_bn_fused_kernel(%arg0: memref<2x4x256xf32, #tpu.memory_space<vmem>>, %arg1: memref<4x1xf32, #tpu.memory_space<vmem>>, %arg2: memref<4x1xf32, #tpu.memory_space<vmem>>, %arg3: memref<2x4x256xf32, #tpu.memory_space<vmem>>) attributes {dimension_semantics = [], scalar_prefetch = 0 : i64, scratch_operands = 0 : i64, tpu.core_type = #tpu.core_type<tc>} {
    %c0 = arith.constant 0 : index
    %c0_0 = arith.constant 0 : index
    %c0_1 = arith.constant 0 : index
    %0 = vector.load %arg0[%c0, %c0_0, %c0_1] : memref<2x4x256xf32, #tpu.memory_space<vmem>>, vector<2x4x256xf32>
    %cst = arith.constant dense<0.000000e+00> : vector<2x4xf32>
    %1 = vector.multi_reduction <add>, %0, %cst [2] : vector<2x4x256xf32> to vector<2x4xf32>
    %2 = vector.shape_cast %1 : vector<2x4xf32> to vector<2x4x1xf32>
    %cst_2 = arith.constant dense<0.000000e+00> : vector<4x1xf32>
    %3 = vector.multi_reduction <add>, %2, %cst_2 [0] : vector<2x4x1xf32> to vector<4x1xf32>
    %4 = vector.shape_cast %3 : vector<4x1xf32> to vector<1x4x1xf32>
    %cst_3 = arith.constant 0.001953125 : f32
    %5 = vector.broadcast %cst_3 : f32 to vector<1x4x1xf32>
    %6 = arith.mulf %4, %5 : vector<1x4x1xf32>
    %7 = vector.broadcast %6 : vector<1x4x1xf32> to vector<2x4x256xf32>
    %8 = arith.subf %0, %7 : vector<2x4x256xf32>
    %9 = arith.mulf %8, %8 : vector<2x4x256xf32>
    %cst_4 = arith.constant dense<0.000000e+00> : vector<2x4xf32>
    %10 = vector.multi_reduction <add>, %9, %cst_4 [2] : vector<2x4x256xf32> to vector<2x4xf32>
    %11 = vector.shape_cast %10 : vector<2x4xf32> to vector<2x4x1xf32>
    %cst_5 = arith.constant dense<0.000000e+00> : vector<4x1xf32>
    %12 = vector.multi_reduction <add>, %11, %cst_5 [0] : vector<2x4x1xf32> to vector<4x1xf32>
    %13 = vector.shape_cast %12 : vector<4x1xf32> to vector<1x4x1xf32>
    %cst_6 = arith.constant 0.001953125 : f32
    %14 = vector.broadcast %cst_6 : f32 to vector<1x4x1xf32>
    %15 = arith.mulf %13, %14 : vector<1x4x1xf32>
    %cst_7 = arith.constant 9.99999974E-6 : f32
    %16 = vector.broadcast %cst_7 : f32 to vector<1x4x1xf32>
    %17 = arith.addf %15, %16 : vector<1x4x1xf32>
    %18 = math.rsqrt %17 : vector<1x4x1xf32>
    %c0_8 = arith.constant 0 : index
    %c0_9 = arith.constant 0 : index
    %19 = vector.load %arg1[%c0_8, %c0_9] : memref<4x1xf32, #tpu.memory_space<vmem>>, vector<4x1xf32>
    %20 = vector.shape_cast %19 : vector<4x1xf32> to vector<1x4x1xf32>
    %c0_10 = arith.constant 0 : index
    %c0_11 = arith.constant 0 : index
    %21 = vector.load %arg2[%c0_10, %c0_11] : memref<4x1xf32, #tpu.memory_space<vmem>>, vector<4x1xf32>
    %22 = vector.shape_cast %21 : vector<4x1xf32> to vector<1x4x1xf32>
    %23 = arith.mulf %20, %18 : vector<1x4x1xf32>
    %24 = vector.broadcast %23 : vector<1x4x1xf32> to vector<2x4x256xf32>
    %25 = arith.mulf %8, %24 : vector<2x4x256xf32>
    %26 = vector.broadcast %22 : vector<1x4x1xf32> to vector<2x4x256xf32>
    %27 = arith.addf %25, %26 : vector<2x4x256xf32>
    %c0_12 = arith.constant 0 : index
    %c0_13 = arith.constant 0 : index
    %c0_14 = arith.constant 0 : index
    %28 = vector.load %arg3[%c0_12, %c0_13, %c0_14] : memref<2x4x256xf32, #tpu.memory_space<vmem>>, vector<2x4x256xf32>
    tpu.vector_store %arg3[%c0_12, %c0_13, %c0_14], %27 {strides = array<i32>} : memref<2x4x256xf32, #tpu.memory_space<vmem>>, vector<2x4x256xf32>,
    return
  }
}

</mosaic_0001>

<bundles_post_ra>
// kernel: tpu_custom_call.1
= control target key start
LH: loop header
LB: loop body
LE: loop exit
PB: predicated region body
PF: predicated region fallthrough
CT: control target
= control target key end

     0   :  { %8 = vsyncpa [#allocation3], 0  ;;  %s249_s0 = inlined_call_operand.hbm [shape: f32[2,4,256], index: 0, kind: input, shape index: {}]   ;;  %s250_s1 = inlined_call_operand.vmem [shape: f32[4,1], index: 1, kind: input, shape index: {}]   ;;  %s251_s2 = inlined_call_operand.vmem [shape: f32[4,1], index: 2, kind: input, shape index: {}]   ;;  %s252_s3 = inlined_call_operand.hbm [shape: f32[2,4,256], index: 3, kind: output, shape index: {}]  }
   0x1   :  { %9 = vsyncpa [#allocation4], 0  ;;  %s193_s12 = smov [#allocation2]  }
   0x2   :  { %s15_s13 = sshll.u32 %s193_s12, 4  ;;  %s16_s13 = int_to_ptr.vmem [resolvable:$true] %s15_s13 }
   0x3   :  { %s157_s14 = scalar_lea.vmem %s16_s13, 256  ;;  %p162_p1 = scmp.lt.s32.totalorder %s16_s13, %s16_s13 }
   0x4   :  { %p158_p0 = scmp.ne.s32.totalorder %s16_s13, %s157_s14  ;;  %p163_p2 = scmp.lt.s32.totalorder %s157_s14, %s157_s14 }
   0x6   :  { %p164_p3 = por %p163_p2, %p162_p1 }
   0x8   :  { %p165_p4 = pnand %p164_p3, %p158_p0 }
   0xa   :  { %168 = shalt.err (!%p165_p4)
}
   0xb   :  { %s194_s15 = smov 128   ;;  %s195_s16 = smov 8  }
   0xc   :  { %21 = dma.hbm_to_vmem [thread:$0]  %s249_s0, 256, %s16_s13, [#allocation3], %s194_s15, %s194_s15, %s195_s16  }
   0xd   :  { %189 = dma.done.wait [#allocation3], 256  }
   0xe   :  { %190 = vsyncadd [#allocation3], 4294967040  ;;  %vm37_vm0 = vcmask 1043456   ;;  %v29_v0 = vld [vmem:[#allocation2] sm:$0xff]  ;;  %v30_v1 = vld [vmem:[#allocation2 + $0x8] sm:$0xff]  ;;  %v56_v12 = vlaneseq  ;;  %v197_v35 = vmov 0  }
   0xf   :  { %v33_v2 = vcombine.high %v29_v0, %v29_v0  ;;  %v38_v3 = vsel %vm37_vm0, %v29_v0, 0.0  ;;  %v34_v4 = vcombine.high %v30_v1, %v30_v1  ;;  %v43_v6 = vsel %vm37_vm0, %v30_v1, 0.0  ;;  %143 = vset.pattern.permute.xlu0 %v197_v35  ;;  %144 = vset.pattern.permute.xlu1 %v197_v35  ;;  %v88_v36 = vld [vmem:[%s251_s2] sm:$0xf]  ;;  %s198_s2 = smov [#allocation5]  }
  0x10   :  { %v196_v10 = vmov 839922192   ;;  %v57_v15 = vshrl.u32 %v56_v12, 7  ;;  %v87_v44 = vld [vmem:[%s250_s1] sm:$0xf]  ;;  %s125_s22 = sshll.u32 %s198_s2, 4  ;;  %s126_s22 = int_to_ptr.vmem [resolvable:$true] %s125_s22 }
  0x11   :  { %v39_v5 = vsel %vm37_vm0, %v33_v2, 0.0  ;;  %v44_v7 = vsel %vm37_vm0, %v34_v4, 0.0  ;;  %v54_v11 = vunpack.c.l.s4 %v196_v10  ;;  %s169_s23 = scalar_lea.vmem %s126_s22, 256  ;;  %p174_p6 = scmp.lt.s32.totalorder %s126_s22, %s126_s22 }
  0x12   :  { %v40_v8 = vadd.f32 %v39_v5, %v38_v3  ;;  %v45_v9 = vadd.f32 %v44_v7, %v43_v6  ;;  %p170_p5 = scmp.ne.s32.totalorder %s126_s22, %s169_s23  ;;  %p175_p7 = scmp.lt.s32.totalorder %s169_s23, %s169_s23 }
  0x13   :  { %v55_v14 = vunpack.c.0.s8 %v54_v11 }
  0x14   :  { %41 = vadd.xlane.f32.xlu0 %v40_v8  ;;  %p176_p8 = por %p175_p7, %p174_p6 }
  0x15   :  { %v58_v19 = vsub.s32 %v55_v14, %v57_v15 }
  0x16   :  { %p177_p9 = pnand %p176_p8, %p170_p5 }
  0x18   :  { %46 = vadd.xlane.f32.xlu0 %v45_v9 }
  0x9d   :  { %v42_v13 = vpop.xlane.xlu0 %41 }
  0x9e   :  { %v48_v17 = vsel %vm37_vm0, %v42_v13, 0.0 }
  0xa1   :  { %v47_v16 = vpop.xlane.xlu0 %46 }
  0xa2   :  { %v49_v18 = vsel %vm37_vm0, %v47_v16, 0.0 }
  0xa3   :  { %v50_v20 = vadd.f32 %v49_v18, %v48_v17 }
  0xa5   :  { %v51_v21 = vmul.f32 0.001953125, %v50_v20 }
  0xa7   :  { %v59_v22 = vrot.slane %v51_v21, %v58_v19 }
  0xa9   :  { %v62_v23 = vsub.f32 %v30_v1, %v59_v22  ;;  %v61_v24 = vsub.f32 %v29_v0, %v59_v22 }
  0xab   :  { %v63_v25 = vmul.f32 %v61_v24, %v61_v24  ;;  %v64_v26 = vmul.f32 %v62_v23, %v62_v23 }
  0xad   :  { %v67_v27 = vcombine.high %v63_v25, %v63_v25  ;;  %v68_v28 = vcombine.high %v64_v26, %v64_v26  ;;  %v71_v29 = vsel %vm37_vm0, %v63_v25, 0.0  ;;  %v76_v33 = vsel %vm37_vm0, %v64_v26, 0.0 }
  0xaf   :  { %v72_v30 = vsel %vm37_vm0, %v67_v27, 0.0  ;;  %v77_v32 = vsel %vm37_vm0, %v68_v28, 0.0 }
  0xb0   :  { %v73_v31 = vadd.f32 %v72_v30, %v71_v29  ;;  %v78_v34 = vadd.f32 %v77_v32, %v76_v33 }
  0xb2   :  { %74 = vadd.xlane.f32.xlu1 %v73_v31 }
  0xb6   :  { %79 = vadd.xlane.f32.xlu1 %v78_v34 }
  0xc7   :  { %106 = vperm.xlu1 %144, %v88_v36  }
 0x13b   :  { %v75_v37 = vpop.xlane.xlu1 %74 }
 0x13c   :  { %v81_v39 = vsel %vm37_vm0, %v75_v37, 0.0 }
 0x13f   :  { %v80_v38 = vpop.xlane.xlu1 %79 }
 0x140   :  { %v82_v40 = vsel %vm37_vm0, %v80_v38, 0.0 }
 0x141   :  { %v83_v41 = vadd.f32 %v82_v40, %v81_v39 }
 0x143   :  { %v84_v42 = vmul.f32 0.001953125, %v83_v41  ;;  %v107_v47 = vpop.permute.xlu1 %106 }
 0x144   :  { %v114_v50 = vrot.slane %v107_v47, %v58_v19 }
 0x145   :  { %v85_v43 = vadd.f32 1e-05, %v84_v42 }
 0x147   :  { %147 = vrsqrt.f32 %v85_v43 }
 0x154   :  { %v148_v45 = vpop.eup %147 }
 0x155   :  { %v89_v46 = vmul.f32 %v148_v45, %v87_v44 }
 0x157   :  { %92 = vperm.xlu0 %143, %v89_v46  }
 0x1d2   :  { %v93_v48 = vpop.permute.xlu0 %92 }
 0x1d3   :  { %v100_v49 = vrot.slane %v93_v48, %v58_v19 }
 0x1d5   :  { %v102_v51 = vmul.f32 %v100_v49, %v61_v24  ;;  %v103_v52 = vmul.f32 %v100_v49, %v62_v23 }
 0x1d7   :  { %v116_v53 = vadd.f32 %v114_v50, %v102_v51  ;;  %v117_v54 = vadd.f32 %v114_v50, %v103_v52 }
 0x1d9   :  { %118 = vst [vmem:[#allocation5] sm:$0xff] %v116_v53  ;;  %119 = vst [vmem:[#allocation5 + $0x8] sm:$0xff] %v117_v54 }
 0x1da   :  { %180 = shalt.err (!%p177_p9)
}
 0x1db   :  { %131 = dma.vmem_to_hbm [thread:$0]  %s126_s22, 256, %s252_s3, [#allocation4], %s194_s15, %s194_s15, %s195_s16  }
 0x1dc   :  { %191 = dma.done.wait [#allocation4], 256  }
 0x1dd   :  { %192 = vsyncadd [#allocation4], 4294967040 }
 0x1de   :  { %135 = vsyncpa [#allocation3], 1 }
 0x1df   :  { %136 = vsyncpa [#allocation4], 1 }

</bundles_post_ra>
